<compile_context>
chip_gen: v6e
topology: v6e:2x2x1
jax: 0.10.0
libtpu: 0.0.40
codegen_flags: <defaults>
</compile_context>

<pallas_src>
import functools

import jax
import jax.numpy as jnp
from jax.experimental import pallas as pl
from jax.experimental.pallas import tpu as pltpu


def calc_alpha(class_num=4):
    # Deterministic synthetic per-class weights (the original derives these
    # from dataset class frequencies; here we fix the values).
    w = jnp.arange(1, class_num + 1, dtype=jnp.float32)
    return w / jnp.sum(w)  # shape (class_num,)


def _round_up(x, m):
    return ((x + m - 1) // m) * m


def _pow_gamma(base, gamma):
    """(1 - p)^gamma, specialized to multiplies for small integer gamma."""
    g = float(gamma)
    if g == int(g) and 0 <= int(g) <= 4:
        gi = int(g)
        if gi == 0:
            return jnp.ones_like(base)
        out = base
        for _ in range(gi - 1):
            out = out * base
        return out
    return jnp.power(base, g)


# ---------------------------------------------------------------------------
# Kernel bodies
# ---------------------------------------------------------------------------
def _kernel_lane_batch(logits_ref, targets_ref, alpha_ref, out_ref, *,
                       gamma, size_average, n_rows, tile_n):
    """Small-C layout: logits (C, TILE_N), batch on lanes, classes on sublanes."""
    i = pl.program_id(0)
    x = logits_ref[...]                    # (C, TILE_N) f32
    t = targets_ref[...]                   # (1, TILE_N) int32
    a = alpha_ref[...]                     # (C, 1)      f32
    C = x.shape[0]

    # Stable log-softmax over the (<=8 sublane) class axis.
    m = jnp.max(x, axis=0, keepdims=True)                         # (1, TILE_N)
    lse = jnp.log(jnp.sum(jnp.exp(x - m), axis=0, keepdims=True))  # (1, TILE_N)

    # One-hot mask via sublane iota compare (out-of-range targets give an
    # all-zero mask, matching scatter_'s undefined-index hazard in PyTorch).
    row = jax.lax.broadcasted_iota(jnp.int32, (C, tile_n), 0)
    mask = (row == t).astype(jnp.float32)
    x_true = jnp.sum(x * mask, axis=0, keepdims=True)              # (1, TILE_N)
    alpha_t = jnp.sum(a * mask, axis=0, keepdims=True)             # (1, TILE_N)

    log_p = x_true - m - lse
    probs = jnp.exp(log_p)
    loss = -alpha_t * _pow_gamma(1.0 - probs, gamma) * log_p       # (1, TILE_N)

    # Mask off padded batch columns.
    col = i * tile_n + jax.lax.broadcasted_iota(jnp.int32, (1, tile_n), 1)
    loss = jnp.where(col < n_rows, loss, 0.0)
    partial = jnp.sum(loss, axis=1, keepdims=True)                 # (1, 1)

    @pl.when(i == 0)
    def _():
        out_ref[...] = jnp.zeros_like(out_ref)

    out_ref[...] += partial

    if size_average:
        @pl.when(i == pl.num_programs(0) - 1)
        def _():
            out_ref[...] = out_ref[...] / jnp.float32(n_rows)


def _kernel_lane_class(logits_ref, targets_ref, alpha_ref, out_ref, *,
                       gamma, size_average, n_rows, tile_n):
    """Large-C layout: logits (TILE_N, C), classes on lanes."""
    i = pl.program_id(0)
    x = logits_ref[...]                    # (TILE_N, C) f32
    t = targets_ref[...]                   # (TILE_N, 1) int32
    a = alpha_ref[...]                     # (1, C)      f32
    C = x.shape[1]

    m = jnp.max(x, axis=1, keepdims=True)                          # (TILE_N, 1)
    lse = jnp.log(jnp.sum(jnp.exp(x - m), axis=1, keepdims=True))  # (TILE_N, 1)

    col = jax.lax.broadcasted_iota(jnp.int32, (tile_n, C), 1)
    mask = (col == t).astype(jnp.float32)
    x_true = jnp.sum(x * mask, axis=1, keepdims=True)              # (TILE_N, 1)
    alpha_t = jnp.sum(mask * a, axis=1, keepdims=True)             # (TILE_N, 1)

    log_p = x_true - m - lse
    probs = jnp.exp(log_p)
    loss = -alpha_t * _pow_gamma(1.0 - probs, gamma) * log_p       # (TILE_N, 1)

    # Mask off padded rows.
    r = i * tile_n + jax.lax.broadcasted_iota(jnp.int32, (tile_n, 1), 0)
    loss = jnp.where(r < n_rows, loss, 0.0)
    partial = jnp.sum(loss, axis=0, keepdims=True)                 # (1, 1)

    @pl.when(i == 0)
    def _():
        out_ref[...] = jnp.zeros_like(out_ref)

    out_ref[...] += partial

    if size_average:
        @pl.when(i == pl.num_programs(0) - 1)
        def _():
            out_ref[...] = out_ref[...] / jnp.float32(n_rows)


# ---------------------------------------------------------------------------
# Wrapper
# ---------------------------------------------------------------------------
def focal_loss(logits, targets, alpha, gamma=2.0, size_average=True):
    """logits: (N, C) float32; targets: (N,) int-class-indices; alpha: (C,)."""
    N, C = logits.shape
    logits = logits.astype(jnp.float32)
    targets = targets.astype(jnp.int32)
    alpha = alpha.astype(jnp.float32)

    cost = pl.CostEstimate(
        flops=10 * N * C,
        transcendentals=N * C + 2 * N,
        bytes_accessed=4 * (N * C + N + C + 1),
    )
    cparams = pltpu.CompilerParams(dimension_semantics=("arbitrary",))

    if C <= 8:
        # Lane-dense transposed layout: batch on the 128-lane axis.
        tile_n = min(32768, _round_up(N, 128))
        n_pad = _round_up(N, tile_n)
        x = jnp.pad(jnp.transpose(logits), ((0, 0), (0, n_pad - N)))   # (C, Np)
        tg = jnp.pad(targets, (0, n_pad - N)).reshape(1, n_pad)        # (1, Np)
        al = alpha.reshape(C, 1)                                       # (C, 1)
        kern = functools.partial(_kernel_lane_batch, gamma=gamma,
                                 size_average=size_average,
                                 n_rows=N, tile_n=tile_n)
        in_specs = [
            pl.BlockSpec((C, tile_n), lambda i: (0, i)),
            pl.BlockSpec((1, tile_n), lambda i: (0, i)),
            pl.BlockSpec((C, 1), lambda i: (0, 0)),
        ]
        args = (x, tg, al)
    else:
        # Row-major layout: classes on lanes.  TILE_N kept conservative so
        # double-buffered blocks fit the smaller scoped-VMEM defaults
        # (16 MiB v5e / 32 MiB v6e,v7x) without raising vmem_limit_bytes.
        tile_n = min(1024, _round_up(N, 8))
        n_pad = _round_up(N, tile_n)
        x = jnp.pad(logits, ((0, n_pad - N), (0, 0)))                  # (Np, C)
        tg = jnp.pad(targets, (0, n_pad - N)).reshape(n_pad, 1)        # (Np, 1)
        al = alpha.reshape(1, C)                                       # (1, C)
        kern = functools.partial(_kernel_lane_class, gamma=gamma,
                                 size_average=size_average,
                                 n_rows=N, tile_n=tile_n)
        in_specs = [
            pl.BlockSpec((tile_n, C), lambda i: (i, 0)),
            pl.BlockSpec((tile_n, 1), lambda i: (i, 0)),
            pl.BlockSpec((1, C), lambda i: (0, 0)),
        ]
        args = (x, tg, al)

    grid = n_pad // tile_n
    out = pl.pallas_call(
        kern,
        out_shape=jax.ShapeDtypeStruct((1, 1), jnp.float32),
        grid=(grid,),
        in_specs=in_specs,
        out_specs=pl.BlockSpec((1, 1), lambda i: (0, 0)),
        compiler_params=cparams,
        cost_estimate=cost,
    )(*args)
    return out[0, 0]


# ---------------------------------------------------------------------------
# Pure-JAX reference (mirrors the PyTorch module exactly)
# ---------------------------------------------------------------------------
def focal_loss_reference(logits, targets, alpha, gamma=2.0, size_average=True):
    P = jax.nn.softmax(logits.astype(jnp.float32), axis=1)
    C = logits.shape[1]
    mask = jax.nn.one_hot(targets, C, dtype=jnp.float32)
    probs = jnp.sum(P * mask, axis=1)
    alpha_t = alpha[targets]
    batch_loss = -alpha_t * jnp.power(1.0 - probs, gamma) * jnp.log(probs)
    return jnp.mean(batch_loss) if size_average else jnp.sum(batch_loss)


if __name__ == "__main__":
    key = jax.random.PRNGKey(0)
    k1, k2, k3, k4 = jax.random.split(key, 4)

    # Small-C case (module default: calc_alpha() -> 4 classes), lane-dense path.
    N, C = 8, 4
    logits = jax.random.normal(k1, (N, C), dtype=jnp.float32)
    targets = jax.random.randint(k2, (N,), 0, C, dtype=jnp.int32)
    alpha = calc_alpha(C)
    loss = jax.block_until_ready(
        focal_loss(logits, targets, alpha, gamma=2.0, size_average=True))
    ref = focal_loss_reference(logits, targets, alpha, gamma=2.0,
                               size_average=True)
    assert jnp.allclose(loss, ref, rtol=1e-4, atol=1e-6), (loss, ref)

    # Larger-C case exercising the classes-on-lanes path.
    N2, C2 = 16, 128
    logits2 = jax.random.normal(k3, (N2, C2), dtype=jnp.float32)
    targets2 = jax.random.randint(k4, (N2,), 0, C2, dtype=jnp.int32)
    alpha2 = calc_alpha(C2)
    loss2 = jax.block_until_ready(
        focal_loss(logits2, targets2, alpha2, gamma=2.0, size_average=True))
    ref2 = focal_loss_reference(logits2, targets2, alpha2, gamma=2.0,
                                size_average=True)
    assert jnp.allclose(loss2, ref2, rtol=1e-4, atol=1e-6), (loss2, ref2)

    print("KERNEL_OK")
</pallas_src>

<mosaic_0001>
module attributes {stable_mosaic.version = 11 : i64} {
  func.func @_kernel_lane_batch(%arg0: i32, %arg1: memref<4x128xf32, #tpu.memory_space<vmem>>, %arg2: memref<1x128xi32, #tpu.memory_space<vmem>>, %arg3: memref<4x1xf32, #tpu.memory_space<vmem>>, %arg4: memref<1x1xf32, #tpu.memory_space<vmem>>) attributes {dimension_semantics = [#tpu.dimension_semantics<arbitrary>], iteration_bounds = array<i64: 1>, scalar_prefetch = 0 : i64, scratch_operands = 0 : i64, tpu.core_type = #tpu.core_type<tc>, window_params = [{transform_indices = @transform_0, window_bounds = array<i64: 4, 128>}, {transform_indices = @transform_1, window_bounds = array<i64: 1, 128>}, {pipeline_mode = #tpu.pipeline_mode<synchronous>, transform_indices = @transform_2, window_bounds = array<i64: 4, 1>}, {pipeline_mode = #tpu.pipeline_mode<synchronous>, transform_indices = @transform_3, window_bounds = array<i64: 1, 1>}]} {
    %c0 = arith.constant 0 : index
    %c0_0 = arith.constant 0 : index
    %0 = vector.load %arg1[%c0, %c0_0] : memref<4x128xf32, #tpu.memory_space<vmem>>, vector<4x128xf32>
    %c0_1 = arith.constant 0 : index
    %c0_2 = arith.constant 0 : index
    %1 = vector.load %arg2[%c0_1, %c0_2] : memref<1x128xi32, #tpu.memory_space<vmem>>, vector<1x128xi32>
    %c0_3 = arith.constant 0 : index
    %c0_4 = arith.constant 0 : index
    %2 = vector.load %arg3[%c0_3, %c0_4] : memref<4x1xf32, #tpu.memory_space<vmem>>, vector<4x1xf32>
    %cst = arith.constant dense<0xFF800000> : vector<128xf32>
    %3 = vector.multi_reduction <maximumf>, %0, %cst [0] : vector<4x128xf32> to vector<128xf32>
    %4 = vector.shape_cast %3 : vector<128xf32> to vector<1x128xf32>
    %5 = vector.broadcast %4 : vector<1x128xf32> to vector<4x128xf32>
    %6 = arith.subf %0, %5 : vector<4x128xf32>
    %7 = math.exp %6 : vector<4x128xf32>
    %cst_5 = arith.constant dense<0.000000e+00> : vector<128xf32>
    %8 = vector.multi_reduction <add>, %7, %cst_5 [0] : vector<4x128xf32> to vector<128xf32>
    %9 = vector.shape_cast %8 : vector<128xf32> to vector<1x128xf32>
    %10 = math.log %9 : vector<1x128xf32>
    %11 = tpu.iota {dimensions = array<i32: 0>} : vector<4x128xi32>
    %12 = vector.broadcast %1 : vector<1x128xi32> to vector<4x128xi32>
    %13 = arith.cmpi eq, %11, %12 : vector<4x128xi32>
    %14 = arith.extui %13 : vector<4x128xi1> to vector<4x128xi32>
    %15 = arith.sitofp %14 : vector<4x128xi32> to vector<4x128xf32>
    %16 = arith.mulf %0, %15 : vector<4x128xf32>
    %cst_6 = arith.constant dense<0.000000e+00> : vector<128xf32>
    %17 = vector.multi_reduction <add>, %16, %cst_6 [0] : vector<4x128xf32> to vector<128xf32>
    %18 = vector.shape_cast %17 : vector<128xf32> to vector<1x128xf32>
    %19 = vector.broadcast %2 : vector<4x1xf32> to vector<4x128xf32>
    %20 = arith.mulf %19, %15 : vector<4x128xf32>
    %cst_7 = arith.constant dense<0.000000e+00> : vector<128xf32>
    %21 = vector.multi_reduction <add>, %20, %cst_7 [0] : vector<4x128xf32> to vector<128xf32>
    %22 = vector.shape_cast %21 : vector<128xf32> to vector<1x128xf32>
    %23 = arith.subf %18, %4 : vector<1x128xf32>
    %24 = arith.subf %23, %10 : vector<1x128xf32>
    %25 = math.exp %24 : vector<1x128xf32>
    %cst_8 = arith.constant 0.000000e+00 : f32
    %26 = vector.broadcast %cst_8 : f32 to vector<1x128xf32>
    %27 = arith.subf %26, %22 : vector<1x128xf32>
    %cst_9 = arith.constant 1.000000e+00 : f32
    %28 = vector.broadcast %cst_9 : f32 to vector<1x128xf32>
    %29 = arith.subf %28, %25 : vector<1x128xf32>
    %30 = arith.mulf %29, %29 : vector<1x128xf32>
    %31 = arith.mulf %27, %30 : vector<1x128xf32>
    %32 = arith.mulf %31, %24 : vector<1x128xf32>
    %c128_i32 = arith.constant 128 : i32
    %33 = arith.muli %arg0, %c128_i32 : i32
    %34 = tpu.iota {dimensions = array<i32: 1>} : vector<1x128xi32>
    %35 = vector.broadcast %33 : i32 to vector<1x128xi32>
    %36 = arith.addi %35, %34 : vector<1x128xi32>
    %c8_i32 = arith.constant 8 : i32
    %37 = vector.broadcast %c8_i32 : i32 to vector<1x128xi32>
    %38 = arith.cmpi slt, %36, %37 : vector<1x128xi32>
    %cst_10 = arith.constant 0.000000e+00 : f32
    %39 = vector.broadcast %cst_10 : f32 to vector<1x128xf32>
    %40 = arith.select %38, %32, %39 : vector<1x128xi1>, vector<1x128xf32>
    %cst_11 = arith.constant dense<0.000000e+00> : vector<1xf32>
    %41 = vector.multi_reduction <add>, %40, %cst_11 [1] : vector<1x128xf32> to vector<1xf32>
    %42 = vector.shape_cast %41 : vector<1xf32> to vector<1x1xf32>
    %c0_i32 = arith.constant 0 : i32
    %43 = arith.cmpi eq, %arg0, %c0_i32 : i32
    %44 = arith.extui %43 : i1 to i32
    %c0_i32_12 = arith.constant 0 : i32
    %45 = arith.cmpi ne, %44, %c0_i32_12 : i32
    scf.if %45 {
      %cst_19 = arith.constant 0.000000e+00 : f32
      %52 = vector.broadcast %cst_19 : f32 to vector<1x1xf32>
      %c0_20 = arith.constant 0 : index
      %c0_21 = arith.constant 0 : index
      %53 = vector.load %arg4[%c0_20, %c0_21] : memref<1x1xf32, #tpu.memory_space<vmem>>, vector<1x1xf32>
      tpu.vector_store %arg4[%c0_20, %c0_21], %52 {strides = array<i32>} : memref<1x1xf32, #tpu.memory_space<vmem>>, vector<1x1xf32>,
    } else {
    }
    %c0_13 = arith.constant 0 : index
    %c0_14 = arith.constant 0 : index
    %46 = vector.load %arg4[%c0_13, %c0_14] : memref<1x1xf32, #tpu.memory_space<vmem>>, vector<1x1xf32>
    %47 = arith.addf %46, %42 : vector<1x1xf32>
    %c0_15 = arith.constant 0 : index
    %c0_16 = arith.constant 0 : index
    %48 = vector.load %arg4[%c0_15, %c0_16] : memref<1x1xf32, #tpu.memory_space<vmem>>, vector<1x1xf32>
    tpu.vector_store %arg4[%c0_15, %c0_16], %47 {strides = array<i32>} : memref<1x1xf32, #tpu.memory_space<vmem>>, vector<1x1xf32>,
    %c0_i32_17 = arith.constant 0 : i32
    %49 = arith.cmpi eq, %arg0, %c0_i32_17 : i32
    %50 = arith.extui %49 : i1 to i32
    %c0_i32_18 = arith.constant 0 : i32
    %51 = arith.cmpi ne, %50, %c0_i32_18 : i32
    scf.if %51 {
      %c0_19 = arith.constant 0 : index
      %c0_20 = arith.constant 0 : index
      %52 = vector.load %arg4[%c0_19, %c0_20] : memref<1x1xf32, #tpu.memory_space<vmem>>, vector<1x1xf32>
      %cst_21 = arith.constant 8.000000e+00 : f32
      %53 = vector.broadcast %cst_21 : f32 to vector<1x1xf32>
      %54 = arith.divf %52, %53 : vector<1x1xf32>
      %c0_22 = arith.constant 0 : index
      %c0_23 = arith.constant 0 : index
      %55 = vector.load %arg4[%c0_22, %c0_23] : memref<1x1xf32, #tpu.memory_space<vmem>>, vector<1x1xf32>
      tpu.vector_store %arg4[%c0_22, %c0_23], %54 {strides = array<i32>} : memref<1x1xf32, #tpu.memory_space<vmem>>, vector<1x1xf32>,
    } else {
    }
    return
  }
  func.func @transform_0(%arg0: i32) -> (i32, i32) {
    %c0_i32 = arith.constant 0 : i32
    %c0_i32_0 = arith.constant 0 : i32
    return %c0_i32, %arg0 : i32, i32
  }
  func.func @transform_1(%arg0: i32) -> (i32, i32) {
    %c0_i32 = arith.constant 0 : i32
    %c0_i32_0 = arith.constant 0 : i32
    return %c0_i32, %arg0 : i32, i32
  }
  func.func @transform_2(%arg0: i32) -> (i32, i32) {
    %c0_i32 = arith.constant 0 : i32
    %c0_i32_0 = arith.constant 0 : i32
    %c0_i32_1 = arith.constant 0 : i32
    return %c0_i32, %c0_i32_0 : i32, i32
  }
  func.func @transform_3(%arg0: i32) -> (i32, i32) {
    %c0_i32 = arith.constant 0 : i32
    %c0_i32_0 = arith.constant 0 : i32
    %c0_i32_1 = arith.constant 0 : i32
    return %c0_i32, %c0_i32_0 : i32, i32
  }
}

</mosaic_0001>

<bundles_post_ra>
// kernel: tpu_custom_call.1
= control target key start
LH: loop header
LB: loop body
LE: loop exit
PB: predicated region body
PF: predicated region fallthrough
CT: control target
= control target key end

     0   :  { %v151_v1 = vmov 0   ;;  %vm90_vm0 = vcmask 0   ;;  %v152_v2 = vmov 0.0   ;;  %s193_s0 = inlined_call_operand.vmem [shape: f32[4,128], index: 0, kind: input, shape index: {}]   ;;  %s194_s1 = inlined_call_operand.vmem [shape: s32[1,128], index: 1, kind: input, shape index: {}]   ;;  %s195_s2 = inlined_call_operand.vmem [shape: f32[4,1], index: 2, kind: input, shape index: {}]   ;;  %s196_s3 = inlined_call_operand.hbm [shape: f32[1,1], index: 3, kind: output, shape index: {}]  }
   0x1   :  { %v17_v0 = vld [vmem:[%s195_s2] sm:$0xf]  ;;  %122 = vset.pattern.permute.xlu0 %v151_v1  ;;  %91 = vst.msk [vmem:[#allocation2] sm:$0x1] %vm90_vm0, %v152_v2 }
   0x2   :  { %57 = vperm.xlu0 %122, %v17_v0  }
   0x3   :  { %8 = vsyncpa [#allocation3], 0  ;;  %vm18_vm1 = vcmask 1043456   ;;  %v15_v3 = vld [vmem:[%s193_s0] sm:$0xf]  ;;  %v38_v14 = vlaneseq  ;;  %s153_s0 = smov [#allocation2]  }
   0x4   :  { %v19_v4 = vsel %vm18_vm1, %v15_v3, -inf  ;;  %v117_v17 = vld [vmem:[%s194_s1] ss:$0 sm:$0xff]  ;;  %s109_s1 = sshll.u32 %s153_s0, 4  ;;  %s110_s1 = int_to_ptr.vmem [resolvable:$true] %s109_s1 }
   0x5   :  { %v20_v5 = vrot.slane %v19_v4, 4  ;;  %v39_v16 = vshrl.u32 %v38_v14, 7  ;;  %v79_v50 = vand.u32 127, %v38_v14  ;;  %s129_s17 = scalar_lea.vmem %s110_s1, 16  ;;  %s133_s18 = scalar_lea.vmem %s110_s1, 32 }
   0x6   :  { %p130_p0 = scmp.ne.s32.totalorder %s110_s1, %s129_s17  ;;  %p134_p1 = scmp.lt.s32.totalorder %s110_s1, %s110_s1 }
   0x7   :  { %v21_v6 = vmax.f32 %v19_v4, %v20_v5  ;;  %vm44_vm2 = vcmp.eq.s32.totalorder %v39_v16, %v117_v17  ;;  %vm82_vm3 = vcmp.lt.s32.totalorder %v79_v50, 8  ;;  %p135_p2 = scmp.lt.s32.totalorder %s133_s18, %s129_s17 }
   0x8   :  { %v118_v20 = vsel %vm44_vm2, 1.0, %v152_v2  ;;  %v92_v55 = vld [vmem:[#allocation2] sm:$0x1] }
   0x9   :  { %v22_v7 = vrot.slane %v21_v6, 2  ;;  %v47_v22 = vmul.f32 %v118_v20, %v15_v3  ;;  %p136_p3 = por %p135_p2, %p134_p1 }
   0xb   :  { %v23_v8 = vmax.f32 %v21_v6, %v22_v7  ;;  %v48_v24 = vsel %vm18_vm1, %v47_v22, 0.0  ;;  %p137_p4 = pnand %p136_p3, %p130_p0 }
   0xc   :  { %v49_v25 = vrot.slane %v48_v24, 4 }
   0xd   :  { %v24_v9 = vrot.slane %v23_v8, 1 }
   0xe   :  { %v50_v27 = vadd.f32 %v49_v25, %v48_v24 }
   0xf   :  { %v25_v10 = vmax.f32 %v23_v8, %v24_v9 }
  0x10   :  { %v51_v29 = vrot.slane %v50_v27, 2 }
  0x11   :  { %v26_v11 = vsub.f32 %v15_v3, %v25_v10 }
  0x12   :  { %v52_v30 = vadd.f32 %v51_v29, %v50_v27 }
  0x13   :  { %v27_v12 = vmul.f32 1.442695, %v26_v11 }
  0x14   :  { %v53_v31 = vrot.slane %v52_v30, 1 }
  0x15   :  { %123 = vpow2.f32 %v27_v12 }
  0x16   :  { %v54_v32 = vadd.f32 %v53_v31, %v52_v30 }
  0x18   :  { %v68_v35 = vsub.f32 %v54_v32, %v25_v10 }
  0x22   :  { %v124_v13 = vpop.eup %123 }
  0x23   :  { %v29_v15 = vsel %vm18_vm1, %v124_v13, 0.0 }
  0x24   :  { %v30_v18 = vrot.slane %v29_v15, 4 }
  0x26   :  { %v31_v19 = vadd.f32 %v30_v18, %v29_v15 }
  0x28   :  { %v32_v21 = vrot.slane %v31_v19, 2 }
  0x2a   :  { %v33_v23 = vadd.f32 %v32_v21, %v31_v19 }
  0x2c   :  { %v34_v26 = vrot.slane %v33_v23, 1 }
  0x2e   :  { %v35_v28 = vadd.f32 %v34_v26, %v33_v23 }
  0x30   :  { %125 = vlog2.f32 %v35_v28 }
  0x3d   :  { %v126_v33 = vpop.eup %125 }
  0x3e   :  { %v37_v34 = vmul.f32 0.6931472, %v126_v33 }
  0x40   :  { %v69_v36 = vsub.f32 %v68_v35, %v37_v34 }
  0x42   :  { %v70_v37 = vmul.f32 1.442695, %v69_v36 }
  0x44   :  { %127 = vpow2.f32 %v70_v37 }
  0x51   :  { %v128_v43 = vpop.eup %127 }
  0x52   :  { %v73_v46 = vsub.f32 1.0, %v128_v43 }
  0x54   :  { %v74_v49 = vmul.f32 %v73_v46, %v73_v46 }
  0x7d   :  { %v58_v38 = vpop.permute.xlu0 %57 }
  0x7e   :  { %v60_v39 = vmul.f32 %v118_v20, %v58_v38 }
  0x80   :  { %v61_v40 = vsel %vm18_vm1, %v60_v39, 0.0 }
  0x81   :  { %v62_v41 = vrot.slane %v61_v40, 4 }
  0x83   :  { %v63_v42 = vadd.f32 %v62_v41, %v61_v40 }
  0x85   :  { %v64_v44 = vrot.slane %v63_v42, 2 }
  0x87   :  { %v65_v45 = vadd.f32 %v64_v44, %v63_v42 }
  0x89   :  { %v66_v47 = vrot.slane %v65_v45, 1 }
  0x8b   :  { %v67_v48 = vadd.f32 %v66_v47, %v65_v45 }
  0x8d   :  { %v72_v51 = vsub.f32 0.0, %v67_v48 }
  0x8f   :  { %v75_v52 = vmul.f32 %v74_v49, %v72_v51 }
  0x91   :  { %v76_v53 = vmul.f32 %v75_v52, %v69_v36 }
  0x93   :  { %v83_v54 = vsel %vm82_vm3, %v76_v53, 0.0 }
  0x94   :  { %84 = vadd.xlane.f32.xlu0 %v83_v54 }
 0x11d   :  { %v85_v56 = vpop.xlane.xlu0 %84 }
 0x11e   :  { %v93_v57 = vadd.f32 %v92_v55, %v85_v56 }
 0x120   :  { %95 = vst.msk [vmem:[#allocation2] sm:$0x1] %vm90_vm0, %v93_v57 }
 0x127   :  { %v99_v58 = vld [vmem:[#allocation2] sm:$0x1] }
 0x128   :  { %v101_v59 = vmul.f32 0.125, %v99_v58 }
 0x12a   :  { %102 = vst.msk [vmem:[#allocation2] sm:$0x1] %vm90_vm0, %v101_v59 }
 0x12b   :  { %140 = shalt.err (!%p137_p4)
}
 0x12c   :  { %112 = dma.vmem_to_hbm [thread:$0]  %s110_s1, 16, %s196_s3, [#allocation3]  }
 0x12d   :  { %149 = dma.done.wait [#allocation3], 16  }
 0x12e   :  { %150 = vsyncadd [#allocation3], 4294967280 }
 0x12f   :  { %116 = vsyncpa [#allocation3], 1 }

</bundles_post_ra>
